<compile_context>
chip_gen: v5e
topology: v5e:2x2
jax: 0.10.0
libtpu: 0.0.40
codegen_flags: <defaults>
</compile_context>

<pallas_src>
import math
from functools import partial

import jax
import jax.numpy as jnp
from jax.experimental import pallas as pl
from jax.experimental.pallas import tpu as pltpu

MINUS_INF = -10000.0
LN_EPS = 1e-12
COMPUTE_DTYPE = jnp.bfloat16   # MXU operand dtype; accumulation is always f32


def _pick_tile(dim, target, align):
    """Largest multiple of `align` that is <= target and divides dim; else the full dim."""
    if dim <= target:
        return dim
    t = (min(target, dim) // align) * align
    while t >= align:
        if dim % t == 0:
            return t
        t -= align
    return dim


# ----------------------------- Kernel 1: LayerNorm + QKV GEMM -----------------------------
def _qkv_ln_gemm_kernel(x_ref, gamma_ref, beta_ref, w_ref, b_ref,
                        qkv_ref, norm_ref, xn_ref):
    # Grid: (i over row tiles, j over 3H column tiles).  j is the inner (sequential) axis:
    # LayerNorm of the current row tile is computed once at j == 0, cached in a bf16 VMEM
    # scratch (MXU operand) and in the resident norm output block, then reused for every
    # column tile of the QKV weight.
    @pl.when(pl.program_id(1) == 0)
    def _():
        x = x_ref[...].astype(jnp.float32)
        mean = jnp.mean(x, axis=-1, keepdims=True)
        var = jnp.mean(jnp.square(x - mean), axis=-1, keepdims=True)
        norm = (x - mean) * jax.lax.rsqrt(var + LN_EPS)
        norm = norm * gamma_ref[...] + beta_ref[...]
        norm_ref[...] = norm.astype(norm_ref.dtype)
        xn_ref[...] = norm.astype(xn_ref.dtype)

    acc = jnp.dot(xn_ref[...], w_ref[...].astype(COMPUTE_DTYPE),
                  preferred_element_type=jnp.float32)
    qkv_ref[...] = (acc + b_ref[...]).astype(qkv_ref.dtype)


def qkv_ln_gemm(x2d, gamma, beta, w, b):
    BS, H = x2d.shape
    H3 = w.shape[1]
    tm = _pick_tile(BS, 256, 8)
    tn = _pick_tile(H3, 256, 128)
    grid = (BS // tm, H3 // tn)
    return pl.pallas_call(
        _qkv_ln_gemm_kernel,
        out_shape=(
            jax.ShapeDtypeStruct((BS, H3), x2d.dtype),
            jax.ShapeDtypeStruct((BS, H), x2d.dtype),
        ),
        grid=grid,
        in_specs=[
            pl.BlockSpec((tm, H), lambda i, j: (i, 0)),   # x rows (full H: needed for LN)
            pl.BlockSpec((1, H), lambda i, j: (0, 0)),    # gamma
            pl.BlockSpec((1, H), lambda i, j: (0, 0)),    # beta
            pl.BlockSpec((H, tn), lambda i, j: (0, j)),   # qkv weight column slab
            pl.BlockSpec((1, tn), lambda i, j: (0, j)),   # qkv bias slab
        ],
        out_specs=(
            pl.BlockSpec((tm, tn), lambda i, j: (i, j)),  # qkv
            pl.BlockSpec((tm, H), lambda i, j: (i, 0)),   # inp_norm (resident across j)
        ),
        scratch_shapes=[pltpu.VMEM((tm, H), COMPUTE_DTYPE)],
        compiler_params=pltpu.CompilerParams(
            dimension_semantics=("parallel", "arbitrary")),
    )(x2d, gamma.reshape(1, H), beta.reshape(1, H), w, b.reshape(1, H3))


# --------------------- Kernel 2: attention (scores + softmax + context) --------------------
def _attend_all_heads(qkv, bias_fn, o_ref, *, heads, head_size, hidden, scale):
    ctxs = []
    for h in range(heads):                                # static unroll over heads
        lo = h * head_size
        q = qkv[:, lo:lo + head_size].astype(COMPUTE_DTYPE)
        k = qkv[:, hidden + lo:hidden + lo + head_size].astype(COMPUTE_DTYPE)
        v = qkv[:, 2 * hidden + lo:2 * hidden + lo + head_size].astype(COMPUTE_DTYPE)
        # contract directly on the head dim -> no explicit k.T / XLU transpose
        s = jax.lax.dot_general(q, k, (((1,), (1,)), ((), ())),
                                preferred_element_type=jnp.float32) * scale
        s = bias_fn(s)
        m = jnp.max(s, axis=-1, keepdims=True)
        e = jnp.exp(s - m)
        p = e * pl.reciprocal(jnp.sum(e, axis=-1, keepdims=True), approx=True)
        ctxs.append(jnp.dot(p.astype(COMPUTE_DTYPE), v,
                            preferred_element_type=jnp.float32))
    # single lane-dense (S, H) store covering all heads
    o_ref[0] = jnp.concatenate(ctxs, axis=-1).astype(o_ref.dtype)


def _attn_kernel_tri(qkv_ref, o_ref, *, heads, head_size, hidden, scale):
    qkv = qkv_ref[0]                                      # (S, 3H)
    S = qkv.shape[0]
    row = jax.lax.broadcasted_iota(jnp.int32, (S, S), 0)
    col = jax.lax.broadcasted_iota(jnp.int32, (S, S), 1)
    causal = col <= row
    _attend_all_heads(qkv, lambda s: jnp.where(causal, s, MINUS_INF), o_ref,
                      heads=heads, head_size=head_size, hidden=hidden, scale=scale)


def _attn_kernel_mask(qkv_ref, mask_ref, o_ref, *, heads, head_size, hidden, scale):
    qkv = qkv_ref[0]                                      # (S, 3H)
    mask = mask_ref[0, 0]                                 # (1, S) additive mask
    _attend_all_heads(qkv, lambda s: s + mask, o_ref,
                      heads=heads, head_size=head_size, hidden=hidden, scale=scale)


def attention(qkv3d, input_mask, *, heads, head_size, hidden, triangular, scale):
    # TODO(synk): for long sequences convert to flash-style KV tiling (running max/sum +
    #             accumulator scratch) instead of materializing the full SxS score matrix.
    B, S, H3 = qkv3d.shape
    qkv_spec = pl.BlockSpec((1, S, H3), lambda b: (b, 0, 0))
    out_spec = pl.BlockSpec((1, S, hidden), lambda b: (b, 0, 0))
    if triangular:
        kern = partial(_attn_kernel_tri, heads=heads, head_size=head_size,
                       hidden=hidden, scale=scale)
        in_specs = [qkv_spec]
        args = (qkv3d,)
    else:
        kern = partial(_attn_kernel_mask, heads=heads, head_size=head_size,
                       hidden=hidden, scale=scale)
        mask_spec = pl.BlockSpec((1, 1, 1, S), lambda b: (b, 0, 0, 0))
        in_specs = [qkv_spec, mask_spec]
        args = (qkv3d, input_mask)
    return pl.pallas_call(
        kern,
        out_shape=jax.ShapeDtypeStruct((B, S, hidden), qkv3d.dtype),
        grid=(B,),
        in_specs=in_specs,
        out_specs=out_spec,
        compiler_params=pltpu.CompilerParams(dimension_semantics=("parallel",)),
    )(*args)


# ----------------------------- Kernel 3: output projection --------------------------------
def _proj_kernel(x_ref, w_ref, o_ref, acc_ref):
    @pl.when(pl.program_id(2) == 0)
    def _():
        acc_ref[...] = jnp.zeros_like(acc_ref)

    acc_ref[...] += jnp.dot(x_ref[...].astype(COMPUTE_DTYPE),
                            w_ref[...].astype(COMPUTE_DTYPE),
                            preferred_element_type=jnp.float32)

    @pl.when(pl.program_id(2) == pl.num_programs(2) - 1)
    def _():
        o_ref[...] = acc_ref[...].astype(o_ref.dtype)


def out_proj(x2d, w):
    BS, H = x2d.shape
    Ho = w.shape[1]
    tm = _pick_tile(BS, 256, 8)
    tn = _pick_tile(Ho, 256, 128)
    tk = _pick_tile(H, 512, 128)
    grid = (BS // tm, Ho // tn, H // tk)
    return pl.pallas_call(
        _proj_kernel,
        out_shape=jax.ShapeDtypeStruct((BS, Ho), x2d.dtype),
        grid=grid,
        in_specs=[
            pl.BlockSpec((tm, tk), lambda i, j, k: (i, k)),
            pl.BlockSpec((tk, tn), lambda i, j, k: (k, j)),
        ],
        out_specs=pl.BlockSpec((tm, tn), lambda i, j, k: (i, j)),
        scratch_shapes=[pltpu.VMEM((tm, tn), jnp.float32)],
        compiler_params=pltpu.CompilerParams(
            dimension_semantics=("parallel", "parallel", "arbitrary")),
    )(x2d, w)


# ------------------------------------ full forward -----------------------------------------
def triton_self_attention_forward(x, input_mask, params, *, heads, triangular, scale):
    B, S, H = x.shape
    head_size = H // heads

    # Weights feed the MXU in bf16 (f32 accumulation); cast once at the wrapper level.
    w_qkv = params["attn_qkvw"].astype(COMPUTE_DTYPE)
    w_out = params["attn_ow"].astype(COMPUTE_DTYPE)

    qkv2d, norm2d = qkv_ln_gemm(
        x.reshape(B * S, H),
        params["norm_w"], params["norm_b"],
        w_qkv, params["attn_qkvb"],
    )
    qkv = qkv2d.reshape(B, S, 3 * H)
    inp_norm = norm2d.reshape(B, S, H)

    # Attention works directly on the fused (B, S, 3H) qkv; head split/merge is done
    # inside the kernel, so the two XLA activation transposes are gone.
    context_layer = attention(qkv, input_mask, heads=heads, head_size=head_size,
                              hidden=H, triangular=triangular, scale=scale)

    output = out_proj(context_layer.reshape(B * S, H), w_out).reshape(B, S, H)

    key_layer = qkv[:, :, H:2 * H]
    value_layer = qkv[:, :, 2 * H:]
    return output, key_layer, value_layer, context_layer, inp_norm


if __name__ == "__main__":
    # Small config consistent with the module: hidden=32, heads=4, head_size=8, seq=16, batch=2
    B, S, H, HEADS = 2, 16, 32, 4
    HEAD_SIZE = H // HEADS
    DTYPE = jnp.float32

    # scale as in __init__: norm_factor = sqrt(head_size); not use_mup -> sqrt again;
    # scale = 1 / norm_factor**2 = 1 / sqrt(head_size)   (scale_attention=True, layer_id=0)
    norm_factor = math.sqrt(math.sqrt(H // HEADS))
    SCALE = 1.0 / norm_factor / norm_factor

    key = jax.random.PRNGKey(0)
    ks = jax.random.split(key, 7)
    params = {
        "attn_qkvw": (0.02 * jax.random.normal(ks[0], (H, 3 * H))).astype(DTYPE),
        "attn_qkvb": (0.02 * jax.random.normal(ks[1], (3 * H,))).astype(DTYPE),
        "attn_ow": (0.02 * jax.random.normal(ks[2], (H, H))).astype(DTYPE),
        # attn_ob exists in the module but is not used in this forward path
        "norm_w": (1.0 + 0.01 * jax.random.normal(ks[3], (H,))).astype(DTYPE),
        "norm_b": (0.01 * jax.random.normal(ks[4], (H,))).astype(DTYPE),
    }

    x = jax.random.normal(ks[5], (B, S, H)).astype(DTYPE)
    # additive fp attention mask (B, 1, 1, S): 0 for attend, -10000 for masked last 4 keys
    mask = jnp.concatenate(
        [jnp.zeros((B, 1, 1, S - 4)), jnp.full((B, 1, 1, 4), MINUS_INF)], axis=-1
    ).astype(DTYPE)

    # triangular_masking=True path (config default): mask ignored, causal mask applied in-kernel
    out_tri = triton_self_attention_forward(
        x, mask, params, heads=HEADS, triangular=True, scale=SCALE
    )
    # non-triangular path: additive input_mask applied before softmax
    out_msk = triton_self_attention_forward(
        x, mask, params, heads=HEADS, triangular=False, scale=SCALE
    )

    for o in (*out_tri, *out_msk):
        jax.block_until_ready(o)

    output, key_layer, value_layer, context_layer, inp_norm = out_tri
    assert output.shape == (B, S, H)
    assert key_layer.shape == (B, S, H) and value_layer.shape == (B, S, H)
    assert context_layer.shape == (B, S, H) and inp_norm.shape == (B, S, H)
    print("KERNEL_OK")
</pallas_src>

<mosaic_0001>
module attributes {stable_mosaic.version = 11 : i64} {
  func.func @_qkv_ln_gemm_kernel(%arg0: i32, %arg1: i32, %arg2: memref<32x32xf32, #tpu.memory_space<vmem>>, %arg3: memref<1x32xf32, #tpu.memory_space<vmem>>, %arg4: memref<1x32xf32, #tpu.memory_space<vmem>>, %arg5: memref<32x96xbf16, #tpu.memory_space<vmem>>, %arg6: memref<1x96xf32, #tpu.memory_space<vmem>>, %arg7: memref<32x96xf32, #tpu.memory_space<vmem>>, %arg8: memref<32x32xf32, #tpu.memory_space<vmem>>, %arg9: memref<32x32xbf16, #tpu.memory_space<vmem>>) attributes {dimension_semantics = [#tpu.dimension_semantics<parallel>, #tpu.dimension_semantics<arbitrary>], iteration_bounds = array<i64: 1, 1>, scalar_prefetch = 0 : i64, scratch_operands = 1 : i64, tpu.core_type = #tpu.core_type<tc>, window_params = [{transform_indices = @transform_0, window_bounds = array<i64: 32, 32>}, {pipeline_mode = #tpu.pipeline_mode<synchronous>, transform_indices = @transform_1, window_bounds = array<i64: 1, 32>}, {pipeline_mode = #tpu.pipeline_mode<synchronous>, transform_indices = @transform_2, window_bounds = array<i64: 1, 32>}, {transform_indices = @transform_3, window_bounds = array<i64: 32, 96>}, {transform_indices = @transform_4, window_bounds = array<i64: 1, 96>}, {transform_indices = @transform_5, window_bounds = array<i64: 32, 96>}, {transform_indices = @transform_6, window_bounds = array<i64: 32, 32>}]} {
    %c0_i32 = arith.constant 0 : i32
    %0 = arith.cmpi eq, %arg1, %c0_i32 : i32
    %1 = arith.extui %0 : i1 to i32
    %c0_i32_0 = arith.constant 0 : i32
    %2 = arith.cmpi ne, %1, %c0_i32_0 : i32
    scf.if %2 {
      %c0_8 = arith.constant 0 : index
      %c0_9 = arith.constant 0 : index
      %10 = vector.load %arg2[%c0_8, %c0_9] : memref<32x32xf32, #tpu.memory_space<vmem>>, vector<32x32xf32>
      %cst_10 = arith.constant dense<0.000000e+00> : vector<32xf32>
      %11 = vector.multi_reduction <add>, %10, %cst_10 [1] : vector<32x32xf32> to vector<32xf32>
      %12 = vector.shape_cast %11 : vector<32xf32> to vector<32x1xf32>
      %cst_11 = arith.constant 3.200000e+01 : f32
      %13 = vector.broadcast %cst_11 : f32 to vector<32x1xf32>
      %14 = arith.divf %12, %13 : vector<32x1xf32>
      %15 = vector.broadcast %14 : vector<32x1xf32> to vector<32x32xf32>
      %16 = arith.subf %10, %15 : vector<32x32xf32>
      %17 = arith.mulf %16, %16 : vector<32x32xf32>
      %cst_12 = arith.constant dense<0.000000e+00> : vector<32xf32>
      %18 = vector.multi_reduction <add>, %17, %cst_12 [1] : vector<32x32xf32> to vector<32xf32>
      %19 = vector.shape_cast %18 : vector<32xf32> to vector<32x1xf32>
      %cst_13 = arith.constant 3.200000e+01 : f32
      %20 = vector.broadcast %cst_13 : f32 to vector<32x1xf32>
      %21 = arith.divf %19, %20 : vector<32x1xf32>
      %22 = vector.broadcast %14 : vector<32x1xf32> to vector<32x32xf32>
      %23 = arith.subf %10, %22 : vector<32x32xf32>
      %cst_14 = arith.constant 9.99999996E-13 : f32
      %24 = vector.broadcast %cst_14 : f32 to vector<32x1xf32>
      %25 = arith.addf %21, %24 : vector<32x1xf32>
      %26 = math.rsqrt %25 : vector<32x1xf32>
      %27 = vector.broadcast %26 : vector<32x1xf32> to vector<32x32xf32>
      %28 = arith.mulf %23, %27 : vector<32x32xf32>
      %c0_15 = arith.constant 0 : index
      %c0_16 = arith.constant 0 : index
      %29 = vector.load %arg3[%c0_15, %c0_16] : memref<1x32xf32, #tpu.memory_space<vmem>>, vector<1x32xf32>
      %30 = vector.broadcast %29 : vector<1x32xf32> to vector<32x32xf32>
      %31 = arith.mulf %28, %30 : vector<32x32xf32>
      %c0_17 = arith.constant 0 : index
      %c0_18 = arith.constant 0 : index
      %32 = vector.load %arg4[%c0_17, %c0_18] : memref<1x32xf32, #tpu.memory_space<vmem>>, vector<1x32xf32>
      %33 = vector.broadcast %32 : vector<1x32xf32> to vector<32x32xf32>
      %34 = arith.addf %31, %33 : vector<32x32xf32>
      %c0_19 = arith.constant 0 : index
      %c0_20 = arith.constant 0 : index
      %35 = vector.load %arg8[%c0_19, %c0_20] : memref<32x32xf32, #tpu.memory_space<vmem>>, vector<32x32xf32>
      tpu.vector_store %arg8[%c0_19, %c0_20], %34 {strides = array<i32>} : memref<32x32xf32, #tpu.memory_space<vmem>>, vector<32x32xf32>,
      %36 = arith.truncf %34 : vector<32x32xf32> to vector<32x32xbf16>
      %c0_21 = arith.constant 0 : index
      %c0_22 = arith.constant 0 : index
      %37 = vector.load %arg9[%c0_21, %c0_22] : memref<32x32xbf16, #tpu.memory_space<vmem>>, vector<32x32xbf16>
      tpu.vector_store %arg9[%c0_21, %c0_22], %36 {strides = array<i32>} : memref<32x32xbf16, #tpu.memory_space<vmem>>, vector<32x32xbf16>,
    } else {
    }
    %c0 = arith.constant 0 : index
    %c0_1 = arith.constant 0 : index
    %3 = vector.load %arg9[%c0, %c0_1] : memref<32x32xbf16, #tpu.memory_space<vmem>>, vector<32x32xbf16>
    %c0_2 = arith.constant 0 : index
    %c0_3 = arith.constant 0 : index
    %4 = vector.load %arg5[%c0_2, %c0_3] : memref<32x96xbf16, #tpu.memory_space<vmem>>, vector<32x96xbf16>
    %cst = arith.constant dense<0.000000e+00> : vector<32x96xf32>
    %5 = tpu.matmul %3, %4, %cst {dimension_numbers = #tpu.dot_dimension_numbers<[1], [0], [0], [1], [0, 0, 1, 1], [], []>} : vector<32x32xbf16>, vector<32x96xbf16>, vector<32x96xf32> -> vector<32x96xf32>
    %c0_4 = arith.constant 0 : index
    %c0_5 = arith.constant 0 : index
    %6 = vector.load %arg6[%c0_4, %c0_5] : memref<1x96xf32, #tpu.memory_space<vmem>>, vector<1x96xf32>
    %7 = vector.broadcast %6 : vector<1x96xf32> to vector<32x96xf32>
    %8 = arith.addf %5, %7 : vector<32x96xf32>
    %c0_6 = arith.constant 0 : index
    %c0_7 = arith.constant 0 : index
    %9 = vector.load %arg7[%c0_6, %c0_7] : memref<32x96xf32, #tpu.memory_space<vmem>>, vector<32x96xf32>
    tpu.vector_store %arg7[%c0_6, %c0_7], %8 {strides = array<i32>} : memref<32x96xf32, #tpu.memory_space<vmem>>, vector<32x96xf32>,
    return
  }
  func.func @transform_0(%arg0: i32, %arg1: i32) -> (i32, i32) {
    %c0_i32 = arith.constant 0 : i32
    %c0_i32_0 = arith.constant 0 : i32
    return %arg0, %c0_i32 : i32, i32
  }
  func.func @transform_1(%arg0: i32, %arg1: i32) -> (i32, i32) {
    %c0_i32 = arith.constant 0 : i32
    %c0_i32_0 = arith.constant 0 : i32
    %c0_i32_1 = arith.constant 0 : i32
    return %c0_i32, %c0_i32_0 : i32, i32
  }
  func.func @transform_2(%arg0: i32, %arg1: i32) -> (i32, i32) {
    %c0_i32 = arith.constant 0 : i32
    %c0_i32_0 = arith.constant 0 : i32
    %c0_i32_1 = arith.constant 0 : i32
    return %c0_i32, %c0_i32_0 : i32, i32
  }
  func.func @transform_3(%arg0: i32, %arg1: i32) -> (i32, i32) {
    %c0_i32 = arith.constant 0 : i32
    %c0_i32_0 = arith.constant 0 : i32
    return %c0_i32, %arg1 : i32, i32
  }
  func.func @transform_4(%arg0: i32, %arg1: i32) -> (i32, i32) {
    %c0_i32 = arith.constant 0 : i32
    %c0_i32_0 = arith.constant 0 : i32
    return %c0_i32, %arg1 : i32, i32
  }
  func.func @transform_5(%arg0: i32, %arg1: i32) -> (i32, i32) {
    %c0_i32 = arith.constant 0 : i32
    return %arg0, %arg1 : i32, i32
  }
  func.func @transform_6(%arg0: i32, %arg1: i32) -> (i32, i32) {
    %c0_i32 = arith.constant 0 : i32
    %c0_i32_0 = arith.constant 0 : i32
    return %arg0, %c0_i32 : i32, i32
  }
}

</mosaic_0001>

<bundles_post_ra>
// kernel: tpu_custom_call.1
= control target key start
LH: loop header
LB: loop body
LE: loop exit
PB: predicated region body
PF: predicated region fallthrough
CT: control target
= control target key end

     0   :  { %12 = vsyncpa [#allocation4], 0  ;;  %s598_s0 = inlined_call_operand.hbm [shape: f32[32,32], index: 0, kind: input, shape index: {}]   ;;  %s599_s1 = inlined_call_operand.hbm [shape: f32[1,32], index: 1, kind: input, shape index: {}]   ;;  %s600_s2 = inlined_call_operand.vmem [shape: f32[1,32], index: 2, kind: input, shape index: {}]   ;;  %s601_s3 = inlined_call_operand.hbm [shape: bf16[32,96], index: 3, kind: input, shape index: {}]   ;;  %s602_s4 = inlined_call_operand.vmem [shape: f32[1,96], index: 4, kind: input, shape index: {}]   ;;  %s603_s5 = inlined_call_operand.hbm [shape: f32[32,96], index: 5, kind: output, shape index: {0}]   ;;  %s604_s6 = inlined_call_operand.hbm [shape: f32[32,32], index: 6, kind: output, shape index: {1}]  }
   0x1   :  { %13 = vsyncpa [#allocation7], 0 }
   0x2   :  { %14 = vsyncpa [#allocation5], 0  ;;  %s34_s23 = sshll.u32 %s599_s1, 4  ;;  %s35_s23 = int_to_ptr.hbm [resolvable:$true] %s34_s23 }
   0x3   :  { %15 = vsyncpa [#allocation11], 0  ;;  %s481_s24 = smov [#allocation6]   ;;  %s20_s28 = sshll.u32 %s598_s0, 4  ;;  %s21_s28 = int_to_ptr.hbm [resolvable:$true] %s20_s28 }
   0x4   :  { %s36_s25 = sshll.u32 %s481_s24, 4  ;;  %s482_s29 = smov [#allocation3]   ;;  %s37_s25 = int_to_ptr.vmem [resolvable:$true] %s36_s25 }
   0x5   :  { %39 = dma.hbm_to_vmem [thread:$0]  %s35_s23, 16, %s37_s25, [#allocation7]  }
   0x6   :  { %s22_s30 = sshll.u32 %s482_s29, 4  ;;  %s483_s7 = smov 128   ;;  %s23_s30 = int_to_ptr.vmem [resolvable:$true] %s22_s30 }
   0x7   :  { %s484_s8 = smov 8   ;;  %s46_s10 = sshll.u32 %s601_s3, 4  ;;  %s47_s10 = int_to_ptr.hbm [resolvable:$true] %s46_s10 }
   0x8   :  { %28 = dma.hbm_to_vmem [thread:$0]  %s21_s28, 512, %s23_s30, [#allocation4], %s483_s7, %s483_s7, %s484_s8  }
   0x9   :  { %s485_s11 = smov [#allocation8]   ;;  %s486_s0 = smov 64  }
   0xa   :  { %s48_s12 = sshll.u32 %s485_s11, 4  ;;  %s487_s13 = smov 4   ;;  %s49_s12 = int_to_ptr.vmem [resolvable:$true] %s48_s12 }
   0xb   :  { %54 = dma.hbm_to_vmem [thread:$0]  %s47_s10, 256, %s49_s12, [#allocation7], %s486_s0, %s486_s0, %s487_s13  }
   0xc   :  { %473 = dma.done.wait [#allocation4], 512  }
   0xd   :  { %474 = vsyncadd [#allocation4], 4294966784 }
   0xe   :  { %475 = dma.done.wait [#allocation7], 272  }
   0xf   :  { %476 = vsyncadd [#allocation7], 4294967024  ;;  %vm78_vm0 = vcmask 261120   ;;  %v76_v0 = vld [vmem:[#allocation3 + $0x10] sm:$0xff]  ;;  %v74_v1 = vld [vmem:[#allocation3] sm:$0xff]  ;;  %v488_v8 = vmov 32.0  }
  0x10   :  { %v85_v2 = vsel %vm78_vm0, %v76_v0, 0.0  ;;  %v79_v3 = vsel %vm78_vm0, %v74_v1, 0.0  ;;  %v77_v4 = vld [vmem:[#allocation3 + $0x18] sm:$0xff]  ;;  %v75_v5 = vld [vmem:[#allocation3 + $0x8] sm:$0xff]  ;;  %343 = vrcp.f32 %v488_v8  ;;  %v340_v63 = vld [vmem:[#allocation6] ss:$0 sm:$0xff] }
  0x11   :  { %86 = vadd.xlane.f32.xlu1 %v85_v2  ;;  %80 = vadd.xlane.f32.xlu0 %v79_v3  ;;  %v88_v6 = vsel %vm78_vm0, %v77_v4, 0.0  ;;  %v82_v7 = vsel %vm78_vm0, %v75_v5, 0.0  ;;  %v327_v43 = vld [vmem:[#allocation8 + $0x8] sm:$0xff]  ;;  %v326_v46 = vld [vmem:[#allocation8] sm:$0xff]  ;;  %vm198_vm10 = vcmask 257024   ;;  %s287_s18 = sshll.u32 %s604_s6, 4  ;;  %s288_s18 = int_to_ptr.hbm [resolvable:$true] %s287_s18 }
  0x12   :  { %250 = vmatpush.bf16.msra.mxu0 %v327_v43  ;;  %328 = vmatpush.bf16.msra.mxu1 %v327_v43  ;;  %vm263_vm15 = vcmask 785408   ;;  %s490_s6 = smov [#allocation9]   ;;  %s274_s24 = sshll.u32 %s603_s5, 4  ;;  %s275_s24 = int_to_ptr.hbm [resolvable:$true] %s274_s24 }
  0x13   :  { %s272_s21 = sshll.u32 %s490_s6, 4  ;;  %s273_s21 = int_to_ptr.vmem [resolvable:$true] %s272_s21 }
  0x16   :  { %v344_v9 = vpop.eup %343  ;;  %251 = vmatpush.bf16.msra.mxu0 %v326_v46  ;;  %329 = vmatpush.bf16.msra.mxu1 %v326_v46 }
  0x17   :  { %v92_v10 = vmul.f32 32.0, %v344_v9  ;;  %vm96_vm1 = vweird.f32 %v344_v9 }
  0x19   :  { %89 = vadd.xlane.f32.xlu1 %v88_v6  ;;  %83 = vadd.xlane.f32.xlu0 %v82_v7  ;;  %v93_v11 = vsub.f32 1.0, %v92_v10 }
  0x1b   :  { %v94_v12 = vmul.f32 %v344_v9, %v93_v11 }
  0x1d   :  { %v95_v13 = vadd.f32 %v344_v9, %v94_v12 }
  0x1f   :  { %v97_v14 = vsel %vm96_vm1, %v344_v9, %v95_v13 }
  0x84   :  { %v87_v15 = vpop.xlane.xlu1 %86  ;;  %v81_v16 = vpop.xlane.xlu0 %80 }
  0x85   :  { %v100_v17 = vmul.f32 %v97_v14, %v87_v15  ;;  %v98_v18 = vmul.f32 %v97_v14, %v81_v16 }
  0x87   :  { %v542_v19 = vsub.f32 %v76_v0, %v100_v17  ;;  %v544_v20 = vsub.f32 %v74_v1, %v98_v18 }
  0x89   :  { %v108_v21 = vmul.f32 %v542_v19, %v542_v19  ;;  %v106_v22 = vmul.f32 %v544_v20, %v544_v20 }
  0x8b   :  { %v116_v23 = vsel %vm78_vm0, %v108_v21, 0.0  ;;  %v110_v24 = vsel %vm78_vm0, %v106_v22, 0.0 }
  0x8c   :  { %v90_v25 = vpop.xlane.xlu1 %89  ;;  %117 = vadd.xlane.f32.xlu0 %v116_v23  ;;  %111 = vadd.xlane.f32.xlu2 %v110_v24  ;;  %v84_v26 = vpop.xlane.xlu0 %83 }
  0x8d   :  { %v101_v27 = vmul.f32 %v97_v14, %v90_v25  ;;  %v99_v28 = vmul.f32 %v97_v14, %v84_v26 }
  0x8f   :  { %v552_v29 = vsub.f32 %v77_v4, %v101_v27  ;;  %v554_v30 = vsub.f32 %v75_v5, %v99_v28  ;;  %v341_v4 = vld [vmem:[%s600_s2] ss:$0 sm:$0xff]  ;;  %s489_s2 = smov [#allocation10]  }
  0x90   :  { %s285_s15 = sshll.u32 %s489_s2, 4  ;;  %s286_s15 = int_to_ptr.vmem [resolvable:$true] %s285_s15 }
  0x91   :  { %v109_v31 = vmul.f32 %v552_v29, %v552_v29  ;;  %v107_v32 = vmul.f32 %v554_v30, %v554_v30 }
  0x93   :  { %v119_v33 = vsel %vm78_vm0, %v109_v31, 0.0  ;;  %v113_v34 = vsel %vm78_vm0, %v107_v32, 0.0 }
  0x94   :  { %120 = vadd.xlane.f32.xlu1 %v119_v33  ;;  %114 = vadd.xlane.f32.xlu2 %v113_v34 }
  0xff   :  { %v112_v35 = vpop.xlane.xlu2 %111  ;;  %v118_v36 = vpop.xlane.xlu0 %117 }
 0x100   :  { %v122_v37 = vmul.f32 %v112_v35, %v97_v14  ;;  %v124_v38 = vmul.f32 %v118_v36, %v97_v14 }
 0x102   :  { %v126_v39 = vadd.f32 1e-12, %v122_v37  ;;  %v128_v40 = vadd.f32 1e-12, %v124_v38 }
 0x104   :  { %345 = vrsqrt.f32 %v126_v39  ;;  %vm136_vm4 = vweird.f32 %v126_v39  ;;  %vm156_vm6 = vweird.f32 %v128_v40 }
 0x105   :  { %347 = vrsqrt.f32 %v128_v40 }
 0x107   :  { %v121_v41 = vpop.xlane.xlu1 %120  ;;  %v115_v42 = vpop.xlane.xlu2 %114 }
 0x108   :  { %v125_v44 = vmul.f32 %v121_v41, %v97_v14  ;;  %v123_v45 = vmul.f32 %v115_v42, %v97_v14 }
 0x10a   :  { %v346_v47 = vpop.eup %345  ;;  %v129_v48 = vadd.f32 1e-12, %v125_v44  ;;  %v127_v49 = vadd.f32 1e-12, %v123_v45 }
 0x10b   :  { %v348_v50 = vpop.eup %347  ;;  %v131_v51 = vmul.f32 %v346_v47, %v126_v39  ;;  %vm137_vm2 = vweird.f32 %v346_v47 }
 0x10c   :  { %v151_v52 = vmul.f32 %v348_v50, %v128_v40  ;;  %349 = vrsqrt.f32 %v129_v48  ;;  %vm157_vm3 = vweird.f32 %v348_v50  ;;  %vm138_vm5 = vmor %vm136_vm4, %vm137_vm2  ;;  %vm166_vm11 = vweird.f32 %v129_v48 }
 0x10d   :  { %v132_v53 = vmul.f32 %v346_v47, %v131_v51  ;;  %351 = vrsqrt.f32 %v127_v49  ;;  %vm158_vm7 = vmor %vm156_vm6, %vm157_vm3  ;;  %vm146_vm13 = vweird.f32 %v127_v49 }
 0x10e   :  { %v152_v54 = vmul.f32 %v348_v50, %v151_v52 }
 0x10f   :  { %v133_v55 = vmul.f32 0.5, %v132_v53 }
 0x110   :  { %v153_v56 = vmul.f32 0.5, %v152_v54 }
 0x111   :  { %v134_v57 = vsub.f32 1.5, %v133_v55 }
 0x112   :  { %v350_v58 = vpop.eup %349  ;;  %v154_v59 = vsub.f32 1.5, %v153_v56 }
 0x113   :  { %v352_v60 = vpop.eup %351  ;;  %v135_v61 = vmul.f32 %v346_v47, %v134_v57  ;;  %v161_v62 = vmul.f32 %v350_v58, %v129_v48  ;;  %vm167_vm8 = vweird.f32 %v350_v58 }
 0x114   :  { %v155_v0 = vmul.f32 %v348_v50, %v154_v59  ;;  %v141_v1 = vmul.f32 %v352_v60, %v127_v49  ;;  %vm147_vm9 = vweird.f32 %v352_v60  ;;  %vm168_vm12 = vmor %vm166_vm11, %vm167_vm8 }
 0x115   :  { %v139_v2 = vsel %vm138_vm5, %v346_v47, %v135_v61  ;;  %v162_v3 = vmul.f32 %v350_v58, %v161_v62  ;;  %vm148_vm14 = vmor %vm146_vm13, %vm147_vm9 }
 0x116   :  { %v170_v5 = vmul.f32 %v139_v2, %v544_v20  ;;  %v159_v6 = vsel %vm158_vm7, %v348_v50, %v155_v0  ;;  %v142_v7 = vmul.f32 %v352_v60, %v141_v1 }
 0x117   :  { %v172_v8 = vmul.f32 %v159_v6, %v542_v19  ;;  %v163_v9 = vmul.f32 0.5, %v162_v3 }
 0x118   :  { %v178_v10 = vmul.f32 %v340_v63, %v170_v5  ;;  %v143_v11 = vmul.f32 0.5, %v142_v7 }
 0x119   :  { %v180_v12 = vmul.f32 %v340_v63, %v172_v8  ;;  %v164_v13 = vsub.f32 1.5, %v163_v9 }
 0x11a   :  { %v186_v14 = vadd.f32 %v341_v4, %v178_v10  ;;  %v144_v15 = vsub.f32 1.5, %v143_v11 }
 0x11b   :  { %v188_v16 = vadd.f32 %v341_v4, %v180_v12  ;;  %v165_v17 = vmul.f32 %v350_v58, %v164_v13 }
 0x11c   :  { %v194_v18 = vpack.c.bf16 %v186_v14, %v186_v14  ;;  %190 = vst.msk [vmem:[#allocation10] sm:$0xff] %vm78_vm0, %v186_v14  ;;  %v145_v20 = vmul.f32 %v352_v60, %v144_v15 }
 0x11d   :  { %v196_v19 = vpack.c.bf16 %v188_v16, %v188_v16  ;;  %192 = vst.msk [vmem:[#allocation10 + $0x10] sm:$0xff] %vm78_vm0, %v188_v16  ;;  %v169_v21 = vsel %vm168_vm12, %v350_v58, %v165_v17 }
 0x11e   :  { %199 = vst.msk [vmem:[#allocation2] sm:$0xf] %vm198_vm10, %v194_v18  ;;  %v173_v22 = vmul.f32 %v169_v21, %v552_v29  ;;  %v149_v23 = vsel %vm148_vm14, %v352_v60, %v145_v20 }
 0x11f   :  { %201 = vst.msk [vmem:[#allocation2 + $0x8] sm:$0xf] %vm198_vm10, %v196_v19  ;;  %v171_v24 = vmul.f32 %v149_v23, %v554_v30  ;;  %v342_v30 = vld [vmem:[%s602_s4] ss:$0 sm:$0xff] }
 0x120   :  { %v181_v25 = vmul.f32 %v340_v63, %v173_v22 }
 0x121   :  { %v179_v26 = vmul.f32 %v340_v63, %v171_v24 }
 0x122   :  { %v189_v27 = vadd.f32 %v341_v4, %v181_v25 }
 0x123   :  { %v187_v28 = vadd.f32 %v341_v4, %v179_v26 }
 0x124   :  { %v197_v31 = vpack.c.bf16 %v189_v27, %v189_v27  ;;  %193 = vst.msk [vmem:[#allocation10 + $0x18] sm:$0xff] %vm78_vm0, %v189_v27 }
 0x125   :  { %v195_v32 = vpack.c.bf16 %v187_v28, %v187_v28  ;;  %191 = vst.msk [vmem:[#allocation10 + $0x8] sm:$0xff] %vm78_vm0, %v187_v28 }
 0x126   :  { %202 = vst.msk [vmem:[#allocation2 + $0xc] sm:$0xf] %vm198_vm10, %v197_v31  ;;  %293 = dma.vmem_to_hbm [thread:$0]  %s286_s15, 512, %s288_s18, [#allocation11], %s483_s7, %s483_s7, %s484_s8  }
 0x127   :  { %200 = vst.msk [vmem:[#allocation2 + $0x4] sm:$0xf] %vm198_vm10, %v195_v32 }
 0x12d   :  { %v325_v29 = vld [vmem:[#allocation2 + $0x8] sm:$0xff] }
 0x12e   :  { %v324_v33 = vld [vmem:[#allocation2] sm:$0xff]  ;;  %323 = vmatmul.msk.bf16.vlgmr.msra.gmra.mxu1 %vm78_vm0, %v325_v29 }
 0x12f   :  { %322 = vmatmul.msk.bf16.vlgmr.msra.gmra.mxu0 %vm78_vm0, %v324_v33 }
 0x1ab   :  { %v258_v34 = vpop.f32.mrf.mxu1 }
 0x1ac   :  { %v253_v35 = vpop.f32.mrf.mxu0  ;;  %v259_v36 = vadd.f32 %v342_v30, %v258_v34 }
 0x1ad   :  { %v254_v37 = vadd.f32 %v342_v30, %v253_v35 }
 0x1ae   :  { %266 = vst.msk [vmem:[#allocation9 + $0x10] sm:$0xff] %vm263_vm15, %v259_v36 }
 0x1af   :  { %264 = vst.msk [vmem:[#allocation9] sm:$0xff] %vm263_vm15, %v254_v37 }
 0x1b3   :  { %v260_v38 = vpop.f32.mrf.mxu1 }
 0x1b4   :  { %v255_v39 = vpop.f32.mrf.mxu0  ;;  %v261_v40 = vadd.f32 %v342_v30, %v260_v38 }
 0x1b5   :  { %v256_v41 = vadd.f32 %v342_v30, %v255_v39 }
 0x1b6   :  { %267 = vst.msk [vmem:[#allocation9 + $0x18] sm:$0xff] %vm263_vm15, %v261_v40 }
 0x1b7   :  { %265 = vst.msk [vmem:[#allocation9 + $0x8] sm:$0xff] %vm263_vm15, %v256_v41 }
 0x1b8   :  { %280 = dma.vmem_to_hbm [thread:$0]  %s273_s21, 512, %s275_s24, [#allocation5], %s483_s7, %s483_s7, %s484_s8  }
 0x1b9   :  { %477 = dma.done.wait [#allocation5], 512  }
 0x1ba   :  { %478 = vsyncadd [#allocation5], 4294966784 }
 0x1bb   :  { %479 = dma.done.wait [#allocation11], 512  }
 0x1bc   :  { %480 = vsyncadd [#allocation11], 4294966784 }
 0x1bd   :  { %302 = vsyncpa [#allocation4], 1 }
 0x1be   :  { %303 = vsyncpa [#allocation7], 1 }
 0x1bf   :  { %304 = vsyncpa [#allocation5], 1 }
 0x1c0   :  { %305 = vsyncpa [#allocation11], 1 }

</bundles_post_ra>
